<compile_context>
chip_gen: v7x
topology: tpu7x:2x2x1
jax: 0.10.0
libtpu: 0.0.40
codegen_flags: <defaults>
</compile_context>

<pallas_src>
import functools
import math

import jax
import jax.numpy as jnp
from jax import lax
from jax.experimental import pallas as pl
from jax.experimental.pallas import tpu as pltpu

_VMEM_SPEC = pl.BlockSpec(memory_space=pltpu.MemorySpace.VMEM)


def _flatten_pad(x, max_block_rows):
    """Flatten to (rows_padded, 128) f32 with zero padding.

    Returns (padded_2d, rows_padded, block_rows); block_rows is a multiple of 8 and
    divides rows_padded, so arbitrary element counts (not multiples of 128) work.
    """
    n = x.size
    rows = pl.cdiv(n, 128)
    block_rows = min(max_block_rows, rows)
    block_rows = pl.cdiv(block_rows, 8) * 8
    rows_p = pl.cdiv(rows, block_rows) * block_rows
    flat = x.reshape(-1).astype(jnp.float32)
    pad = rows_p * 128 - n
    if pad:
        flat = jnp.pad(flat, (0, pad))
    return flat.reshape(rows_p, 128), rows_p, block_rows


# ----------------------------------------------------------------------------
# Kernel 1: MSE reconstruction loss (tiled grid + accumulator)
# ----------------------------------------------------------------------------
def _mse_kernel(a_ref, b_ref, out_ref, acc_ref, *, inv_n):
    @pl.when(pl.program_id(0) == 0)
    def _():
        acc_ref[...] = jnp.zeros((1, 1), jnp.float32)

    d = a_ref[...] - b_ref[...]          # zero-padding contributes 0 to the sum
    acc_ref[...] += jnp.sum(d * d, keepdims=True)

    @pl.when(pl.program_id(0) == pl.num_programs(0) - 1)
    def _():
        out_ref[...] = acc_ref[...] * inv_n


def mse_loss(a, b, max_block_rows=1024):
    n = a.size
    a2, rows_p, br = _flatten_pad(a, max_block_rows)
    b2, _, _ = _flatten_pad(b, max_block_rows)   # same shape -> same padding/block
    grid = (rows_p // br,)
    out = pl.pallas_call(
        functools.partial(_mse_kernel, inv_n=1.0 / float(n)),
        out_shape=jax.ShapeDtypeStruct((1, 1), jnp.float32),
        grid=grid,
        in_specs=[pl.BlockSpec((br, 128), lambda i: (i, 0)),
                  pl.BlockSpec((br, 128), lambda i: (i, 0))],
        out_specs=pl.BlockSpec((1, 1), lambda i: (0, 0)),
        scratch_shapes=[pltpu.VMEM((1, 1), jnp.float32)],
        compiler_params=pltpu.CompilerParams(dimension_semantics=("arbitrary",)),
    )(a2, b2)
    return out[0, 0]


# ----------------------------------------------------------------------------
# Kernel 2: EnergyNet + margin + neighborhood-topology loss
# ----------------------------------------------------------------------------
def _energy_margin_kernel(f12_ref,
                          w1_ref, b1_ref, g1_ref, be1_ref, w2_ref, b2_ref,
                          wia_ref, wib_ref, wic_ref, bi1_ref, gi_ref, bei_ref,
                          wi2_ref, bi2_ref, wi3_ref, bi3_ref,
                          out_ref, *, batch, margin):
    B = batch
    BB = B * B
    f12 = f12_ref[...]                       # (2B, D): [f_orig; f_recon]

    def layer_norm(h, g, b):
        mu = jnp.mean(h, axis=-1, keepdims=True)
        var = jnp.mean((h - mu) ** 2, axis=-1, keepdims=True)
        return (h - mu) * lax.rsqrt(var + 1e-5) * g + b        # rsqrt -> EUP slot

    # --- fused encoder over [f1; f2]: one MXU pass / LN per layer instead of two ---
    h = jnp.dot(f12, w1_ref[...], preferred_element_type=jnp.float32) + b1_ref[...]
    h = jnp.maximum(layer_norm(h, g1_ref[...], be1_ref[...]), 0.0)
    e12 = jnp.dot(h, w2_ref[...], preferred_element_type=jnp.float32) + b2_ref[...]
    e1 = e12[:B]                             # (B, H)
    e2 = e12[B:]                             # (B, H)
    H = e1.shape[-1]

    # --- pairwise expansion via broadcasts (pair n = i*B + j), no selection matmuls ---
    e1x = lax.broadcast_in_dim(e1, (B, B, H), (0, 2)).reshape(BB, H)   # row n -> e1[n // B]
    e2x = lax.broadcast_in_dim(e2, (B, B, H), (1, 2)).reshape(BB, H)   # row n -> e2[n % B]
    prod = e1x * e2x

    # interaction: Linear(3H,H) split into the concat chunks -> LN -> ReLU ->
    #              Linear(H,H//2) -> ReLU -> Linear(H//2,1) as VPU multiply + lane reduce
    hh = (jnp.dot(e1x, wia_ref[...], preferred_element_type=jnp.float32)
          + jnp.dot(e2x, wib_ref[...], preferred_element_type=jnp.float32)
          + jnp.dot(prod, wic_ref[...], preferred_element_type=jnp.float32)
          + bi1_ref[...])
    hh = jnp.maximum(layer_norm(hh, gi_ref[...], bei_ref[...]), 0.0)
    hh = jnp.maximum(
        jnp.dot(hh, wi2_ref[...], preferred_element_type=jnp.float32) + bi2_ref[...], 0.0)
    e_flat = jnp.sum(hh * wi3_ref[...], axis=-1, keepdims=True) + bi3_ref[...]   # (BB, 1)

    # --- margin loss over off-diagonal pairs: relu(margin + E[i,j] - E[i,i]) ---
    # Diagonal gather factorized into two thin B^3 matmuls (was a single B^4 mask).
    sel = (lax.broadcasted_iota(jnp.int32, (B, BB), 1)
           == lax.broadcasted_iota(jnp.int32, (B, BB), 0) * (B + 1)).astype(jnp.float32)
    pos = jnp.dot(sel, e_flat, preferred_element_type=jnp.float32)        # (B, 1) = E[i,i]
    grp = (lax.broadcasted_iota(jnp.int32, (BB, B), 0) // B
           == lax.broadcasted_iota(jnp.int32, (BB, B), 1)).astype(jnp.float32)
    pos_flat = jnp.dot(grp, pos, preferred_element_type=jnp.float32)      # (BB, 1)

    n_row = lax.broadcasted_iota(jnp.int32, (BB, 1), 0)
    offdiag = ((n_row // B) != (n_row % B)).astype(jnp.float32)
    losses = jnp.maximum(margin + e_flat - pos_flat, 0.0)
    standard_loss = jnp.sum(losses * offdiag, keepdims=True) / float(B * (B - 1))  # (1,1)

    # --- neighborhood-topology term: cosine-sim top-k via rank counting (exact for
    #     distinct similarities; differs from torch.topk only on exact ties) ---
    k = min(5, B - 1)
    ri = lax.broadcasted_iota(jnp.int32, (B, B), 0)
    ci = lax.broadcasted_iota(jnp.int32, (B, B), 1)
    eye = ri == ci

    def topk_neighbors(f):
        ss = jnp.sum(f * f, axis=-1, keepdims=True)
        fn = f * lax.rsqrt(jnp.maximum(ss, 1e-24))          # == f / max(||f||, 1e-12)
        sim = lax.dot_general(fn, fn, (((1,), (1,)), ((), ())),
                              preferred_element_type=jnp.float32)          # (B, B)
        sim = jnp.where(eye, jnp.float32(-1e30), sim)                      # diag = -inf
        greater = jnp.zeros((B, B), jnp.float32)
        # B is small here; static unroll of XLU rolls is fine (convert to fori_loop
        # with bounded unroll if B grows beyond ~16).
        for s in range(1, B):
            greater = greater + (pltpu.roll(sim, shift=s, axis=1) > sim).astype(jnp.float32)
        return jnp.logical_and(greater < float(k),
                               jnp.logical_not(eye)).astype(jnp.float32)

    nb1 = topk_neighbors(f12[:B])
    nb2 = topk_neighbors(f12[B:])
    inter = jnp.sum(nb1 * nb2, axis=1, keepdims=True)                       # (B, 1)
    union = jnp.sum(jnp.clip(nb1 + nb2, 0.0, 1.0), axis=1, keepdims=True)   # (B, 1)
    jaccard = inter * pl.reciprocal(union + 1e-8, approx=True)
    neighbor_loss = 1.0 - jnp.mean(jaccard, keepdims=True)                  # (1, 1)

    out_ref[...] = standard_loss + 0.3 * neighbor_loss


def energy_margin_loss(f_orig, f_recon, params, margin=1.0):
    B = f_orig.shape[0]
    f12 = jnp.concatenate([f_orig.astype(jnp.float32),
                           f_recon.astype(jnp.float32)], axis=0)   # (2B, D)
    args = (f12,
            params["w1"], params["b1"], params["g1"], params["be1"],
            params["w2"], params["b2"],
            params["wi1_a"], params["wi1_b"], params["wi1_c"], params["bi1"],
            params["gi"], params["bei"],
            params["wi2"], params["bi2"],
            params["wi3"].T, params["bi3"])    # wi3 as a (1, H//2) row for the lane reduce
    out = pl.pallas_call(
        functools.partial(_energy_margin_kernel, batch=B, margin=margin),
        out_shape=jax.ShapeDtypeStruct((1, 1), jnp.float32),
        in_specs=[_VMEM_SPEC] * len(args),
        out_specs=_VMEM_SPEC,
    )(*args)
    return out[0, 0]


# ----------------------------------------------------------------------------
# Kernel 3: compressed-feature sparsity + histogram entropy (torch.histc analogue)
#           Two-pass grid: pass 0 -> sum|x|, min, max; pass 1 -> vectorized histogram.
# ----------------------------------------------------------------------------
def _feature_stats_kernel(x_ref, sp_ref, ent_ref,
                          sum_ref, min_ref, max_ref, cnt_ref,
                          *, n_valid, block_rows, n_bins, sub_rows):
    p = pl.program_id(0)          # 0: reductions   1: histogram + finalize
    c = pl.program_id(1)
    last_c = pl.num_programs(1) - 1

    x = x_ref[...]                                             # (block_rows, 128)
    row_i = lax.broadcasted_iota(jnp.int32, x.shape, 0)
    lane_i = lax.broadcasted_iota(jnp.int32, x.shape, 1)
    flat_i = (c * block_rows + row_i) * 128 + lane_i
    valid = flat_i < n_valid                                   # mask out zero padding

    @pl.when(jnp.logical_and(p == 0, c == 0))
    def _():
        sum_ref[...] = jnp.zeros((1, 1), jnp.float32)
        min_ref[...] = jnp.full((1, 1), jnp.inf, jnp.float32)
        max_ref[...] = jnp.full((1, 1), -jnp.inf, jnp.float32)

    @pl.when(p == 0)
    def _():
        sum_ref[...] += jnp.sum(jnp.where(valid, jnp.abs(x), 0.0), keepdims=True)
        min_ref[...] = jnp.minimum(
            min_ref[...], jnp.min(jnp.where(valid, x, jnp.inf), keepdims=True))
        max_ref[...] = jnp.maximum(
            max_ref[...], jnp.max(jnp.where(valid, x, -jnp.inf), keepdims=True))

    @pl.when(jnp.logical_and(p == 1, c == 0))
    def _():
        cnt_ref[...] = jnp.zeros((1, n_bins), jnp.float32)

    @pl.when(p == 1)
    def _():
        xmin = min_ref[...]                                    # (1, 1)
        xmax = max_ref[...]
        scale = float(n_bins) / (xmax - xmin + 1e-8)           # (1, 1)
        counts = jnp.zeros((1, n_bins), jnp.float32)
        # Vectorized histogram: one-hot compare + reduce, in 8-row slabs so the
        # (slab, 128, 256) one-hot working set stays ~1 MiB.
        for r0 in range(0, block_rows, sub_rows):
            xs = x[r0:r0 + sub_rows]                           # (sub, 128)
            vs = valid[r0:r0 + sub_rows]
            bins = jnp.clip(jnp.floor((xs - xmin) * scale), 0.0,
                            float(n_bins - 1)).astype(jnp.int32)
            bins = jnp.where(vs, bins, -1)                     # padding never matches a bin
            b3 = lax.broadcast_in_dim(bins, (sub_rows, 128, n_bins), (0, 1))
            ids = lax.broadcasted_iota(jnp.int32, (sub_rows, 128, n_bins), 2)
            counts = counts + jnp.sum((b3 == ids).astype(jnp.float32),
                                      axis=(0, 1))[None, :]
        cnt_ref[...] += counts

    @pl.when(jnp.logical_and(p == 1, c == last_c))
    def _():
        total = jnp.sum(cnt_ref[...], keepdims=True)           # == number of valid elems
        prob = cnt_ref[...] / total
        ent_ref[...] = -jnp.sum(prob * jnp.log2(prob + 1e-8), keepdims=True)
        sp_ref[...] = sum_ref[...] * (1.0 / float(n_valid))


def compressed_feature_stats(x, max_block_rows=64):
    n = x.size
    x2, rows_p, br = _flatten_pad(x, max_block_rows)
    nchunks = rows_p // br
    sub = min(8, br)
    sp, ent = pl.pallas_call(
        functools.partial(_feature_stats_kernel, n_valid=n, block_rows=br,
                          n_bins=256, sub_rows=sub),
        out_shape=(jax.ShapeDtypeStruct((1, 1), jnp.float32),
                   jax.ShapeDtypeStruct((1, 1), jnp.float32)),
        grid=(2, nchunks),
        in_specs=[pl.BlockSpec((br, 128), lambda p, c: (c, 0))],
        out_specs=(pl.BlockSpec((1, 1), lambda p, c: (0, 0)),
                   pl.BlockSpec((1, 1), lambda p, c: (0, 0))),
        scratch_shapes=[pltpu.VMEM((1, 1), jnp.float32),       # running sum |x|
                        pltpu.VMEM((1, 1), jnp.float32),       # running min
                        pltpu.VMEM((1, 1), jnp.float32),       # running max
                        pltpu.VMEM((1, 256), jnp.float32)],    # 256-bin counts
        compiler_params=pltpu.CompilerParams(
            dimension_semantics=("arbitrary", "arbitrary")),
    )(x2)
    return sp[0, 0], ent[0, 0]


# ----------------------------------------------------------------------------
# Parameter init (deterministic, matching nn.Linear / nn.LayerNorm shapes)
# ----------------------------------------------------------------------------
def init_energy_net_params(key, feature_dim, hidden_dim):
    def linear(k, fan_in, fan_out):
        kw, kb = jax.random.split(k)
        bound = 1.0 / math.sqrt(fan_in)
        w = jax.random.uniform(kw, (fan_in, fan_out), jnp.float32, -bound, bound)
        b = jax.random.uniform(kb, (1, fan_out), jnp.float32, -bound, bound)
        return w, b

    ks = jax.random.split(key, 5)
    H = hidden_dim
    w1, b1 = linear(ks[0], feature_dim, H)        # encoder Linear(D, H)
    w2, b2 = linear(ks[1], H, H)                  # encoder Linear(H, H)
    wi1, bi1 = linear(ks[2], 3 * H, H)            # interaction Linear(3H, H)
    wi2, bi2 = linear(ks[3], H, H // 2)           # interaction Linear(H, H//2)
    wi3, bi3 = linear(ks[4], H // 2, 1)           # interaction Linear(H//2, 1)
    return dict(
        w1=w1, b1=b1,
        g1=jnp.ones((1, H), jnp.float32), be1=jnp.zeros((1, H), jnp.float32),
        w2=w2, b2=b2,
        wi1_a=wi1[:H], wi1_b=wi1[H:2 * H], wi1_c=wi1[2 * H:], bi1=bi1,
        gi=jnp.ones((1, H), jnp.float32), bei=jnp.zeros((1, H), jnp.float32),
        wi2=wi2, bi2=bi2, wi3=wi3, bi3=bi3,
    )


# ----------------------------------------------------------------------------
# Top-level forward (glue): combines the three kernel results exactly like torch
# ----------------------------------------------------------------------------
def contrastive_loss_with_free_energy(outputs, images, f_orig, f_recon,
                                      compressed_features, params,
                                      tau=1.0, lambda_compress=0.01,
                                      lambda_energy=0.1, beta=0.1, margin=1.0):
    del tau  # stored by the torch module but unused in its forward pass
    recon = mse_loss(outputs, images)
    energy = energy_margin_loss(f_orig, f_recon, params, margin=margin)

    # One tiled launch per compressed feature (ragged sizes); could be batched into a
    # single pallas_call with a row-offset prefetch table if launch overhead matters.
    stats = [compressed_feature_stats(v) for v in compressed_features.values()]
    num = float(len(stats))
    avg_sparsity = sum(s for s, _ in stats) / num
    avg_entropy = sum(e for _, e in stats) / num
    compress = avg_sparsity + beta * avg_entropy

    total = recon + lambda_compress * compress + lambda_energy * energy
    return {"total": total, "recon": recon, "energy": energy, "compress": compress}


if __name__ == "__main__":
    key = jax.random.PRNGKey(0)
    k_out, k_img, k_fo, k_fr, k_c1, k_c2, k_par = jax.random.split(key, 7)

    B, D, H = 8, 32, 32  # batch, feature_dim, hidden_dim (small synthetic sizes)
    outputs = jax.random.normal(k_out, (2, 4, 16, 16), jnp.float32)   # NCHW
    images = jax.random.normal(k_img, (2, 4, 16, 16), jnp.float32)    # NCHW
    f_orig = jax.random.normal(k_fo, (B, D), jnp.float32)
    f_recon = f_orig + 0.1 * jax.random.normal(k_fr, (B, D), jnp.float32)
    compressed_features = {
        "enc1": jax.random.normal(k_c1, (2, 8, 8, 16), jnp.float32),
        "enc2": jax.random.normal(k_c2, (2, 4, 8, 16), jnp.float32),
    }
    params = init_energy_net_params(k_par, D, H)

    losses = contrastive_loss_with_free_energy(
        outputs, images, f_orig, f_recon, compressed_features, params)
    jax.block_until_ready(losses["total"])
    print("KERNEL_OK")
</pallas_src>

<mosaic_0001>
module attributes {stable_mosaic.version = 11 : i64} {
  func.func @_mse_kernel(%arg0: i32, %arg1: memref<16x128xf32, #tpu.memory_space<vmem>>, %arg2: memref<16x128xf32, #tpu.memory_space<vmem>>, %arg3: memref<1x1xf32, #tpu.memory_space<vmem>>, %arg4: memref<1x1xf32, #tpu.memory_space<vmem>>) attributes {dimension_semantics = [#tpu.dimension_semantics<arbitrary>], iteration_bounds = array<i64: 1>, scalar_prefetch = 0 : i64, scratch_operands = 1 : i64, tpu.core_type = #tpu.core_type<tc>, window_params = [{transform_indices = @transform_0, window_bounds = array<i64: 16, 128>}, {transform_indices = @transform_1, window_bounds = array<i64: 16, 128>}, {pipeline_mode = #tpu.pipeline_mode<synchronous>, transform_indices = @transform_2, window_bounds = array<i64: 1, 1>}]} {
    %c0_i32 = arith.constant 0 : i32
    %0 = arith.cmpi eq, %arg0, %c0_i32 : i32
    %1 = arith.extui %0 : i1 to i32
    %c0_i32_0 = arith.constant 0 : i32
    %2 = arith.cmpi ne, %1, %c0_i32_0 : i32
    scf.if %2 {
      %cst_10 = arith.constant 0.000000e+00 : f32
      %18 = vector.broadcast %cst_10 : f32 to vector<1x1xf32>
      %c0_11 = arith.constant 0 : index
      %c0_12 = arith.constant 0 : index
      %19 = vector.load %arg4[%c0_11, %c0_12] : memref<1x1xf32, #tpu.memory_space<vmem>>, vector<1x1xf32>
      tpu.vector_store %arg4[%c0_11, %c0_12], %18 {strides = array<i32>} : memref<1x1xf32, #tpu.memory_space<vmem>>, vector<1x1xf32>,
    } else {
    }
    %c0 = arith.constant 0 : index
    %c0_1 = arith.constant 0 : index
    %3 = vector.load %arg1[%c0, %c0_1] : memref<16x128xf32, #tpu.memory_space<vmem>>, vector<16x128xf32>
    %c0_2 = arith.constant 0 : index
    %c0_3 = arith.constant 0 : index
    %4 = vector.load %arg2[%c0_2, %c0_3] : memref<16x128xf32, #tpu.memory_space<vmem>>, vector<16x128xf32>
    %5 = arith.subf %3, %4 : vector<16x128xf32>
    %c0_4 = arith.constant 0 : index
    %c0_5 = arith.constant 0 : index
    %6 = vector.load %arg4[%c0_4, %c0_5] : memref<1x1xf32, #tpu.memory_space<vmem>>, vector<1x1xf32>
    %7 = arith.mulf %5, %5 : vector<16x128xf32>
    %8 = vector.shape_cast %7 : vector<16x128xf32> to vector<1x16x128xf32>
    %cst = arith.constant dense<0.000000e+00> : vector<1xf32>
    %9 = vector.multi_reduction <add>, %8, %cst [1, 2] : vector<1x16x128xf32> to vector<1xf32>
    %10 = vector.shape_cast %9 : vector<1xf32> to vector<1x1x1xf32>
    %11 = vector.extract %10[0, 0, 0] : f32 from vector<1x1x1xf32>
    %12 = vector.broadcast %11 : f32 to vector<1x1xf32>
    %13 = arith.addf %6, %12 : vector<1x1xf32>
    %c0_6 = arith.constant 0 : index
    %c0_7 = arith.constant 0 : index
    %14 = vector.load %arg4[%c0_6, %c0_7] : memref<1x1xf32, #tpu.memory_space<vmem>>, vector<1x1xf32>
    tpu.vector_store %arg4[%c0_6, %c0_7], %13 {strides = array<i32>} : memref<1x1xf32, #tpu.memory_space<vmem>>, vector<1x1xf32>,
    %c0_i32_8 = arith.constant 0 : i32
    %15 = arith.cmpi eq, %arg0, %c0_i32_8 : i32
    %16 = arith.extui %15 : i1 to i32
    %c0_i32_9 = arith.constant 0 : i32
    %17 = arith.cmpi ne, %16, %c0_i32_9 : i32
    scf.if %17 {
      %c0_10 = arith.constant 0 : index
      %c0_11 = arith.constant 0 : index
      %18 = vector.load %arg4[%c0_10, %c0_11] : memref<1x1xf32, #tpu.memory_space<vmem>>, vector<1x1xf32>
      %cst_12 = arith.constant 4.8828125E-4 : f32
      %19 = vector.broadcast %cst_12 : f32 to vector<1x1xf32>
      %20 = arith.mulf %18, %19 : vector<1x1xf32>
      %c0_13 = arith.constant 0 : index
      %c0_14 = arith.constant 0 : index
      %21 = vector.load %arg3[%c0_13, %c0_14] : memref<1x1xf32, #tpu.memory_space<vmem>>, vector<1x1xf32>
      tpu.vector_store %arg3[%c0_13, %c0_14], %20 {strides = array<i32>} : memref<1x1xf32, #tpu.memory_space<vmem>>, vector<1x1xf32>,
    } else {
    }
    return
  }
  func.func @transform_0(%arg0: i32) -> (i32, i32) {
    %c0_i32 = arith.constant 0 : i32
    %c0_i32_0 = arith.constant 0 : i32
    return %arg0, %c0_i32 : i32, i32
  }
  func.func @transform_1(%arg0: i32) -> (i32, i32) {
    %c0_i32 = arith.constant 0 : i32
    %c0_i32_0 = arith.constant 0 : i32
    return %arg0, %c0_i32 : i32, i32
  }
  func.func @transform_2(%arg0: i32) -> (i32, i32) {
    %c0_i32 = arith.constant 0 : i32
    %c0_i32_0 = arith.constant 0 : i32
    %c0_i32_1 = arith.constant 0 : i32
    return %c0_i32, %c0_i32_0 : i32, i32
  }
}

</mosaic_0001>

<bundles_post_ra>
// kernel: tpu_custom_call.1
= control target key start
LH: loop header
LB: loop body
LE: loop exit
PB: predicated region body
PF: predicated region fallthrough
CT: control target
= control target key end

     0   :  { %7 = vsyncpa [#allocation4], 0  ;;  %s231_s0 = inlined_call_operand.hbm [shape: f32[16,128], index: 0, kind: input, shape index: {}]   ;;  %s232_s1 = inlined_call_operand.hbm [shape: f32[16,128], index: 1, kind: input, shape index: {}]   ;;  %s233_s2 = inlined_call_operand.hbm [shape: f32[1,1], index: 2, kind: output, shape index: {}]  }
   0x1   :  { %8 = vsyncpa [#allocation7], 0 }
   0x2   :  { %9 = vsyncpa [#allocation5], 0  ;;  %s171_s9 = smov [#allocation3]   ;;  %s99_s13 = scalar_lea.hbm %s231_s0, 256 }
   0x3   :  { %s15_s10 = sshll.u32 %s171_s9, 4  ;;  %p100_p0 = scmp.ne.s32.totalorder %s231_s0, %s99_s13  ;;  %s16_s10 = int_to_ptr.vmem [resolvable:$true] %s15_s10 }
   0x4   :  { %p103_p1 = scmp.lt.u32.totalorder %s99_s13, %s231_s0 }
   0x6   :  { %p105_p2 = pnand %p103_p1, %p100_p0 }
   0x8   :  { %108 = shalt.err (!%p105_p2)
}
   0x9   :  { %s109_s18 = scalar_lea.vmem %s16_s10, 256  ;;  %p114_p4 = scmp.lt.s32.totalorder %s16_s10, %s16_s10 }
   0xa   :  { %p110_p3 = scmp.ne.s32.totalorder %s16_s10, %s109_s18  ;;  %p115_p5 = scmp.lt.s32.totalorder %s109_s18, %s109_s18 }
   0xc   :  { %p116_p6 = por %p115_p5, %p114_p4 }
   0xe   :  { %p117_p7 = pnand %p116_p6, %p110_p3 }
  0x10   :  { %120 = shalt.err (!%p117_p7)
}
  0x11   :  { %s172_s19 = smov 128   ;;  %s173_s20 = smov 8  }
  0x12   :  { %21 = dma.hbm_to_vmem [thread:$0]  %s231_s0, 256, %s16_s10, [#allocation4], %s172_s19, %s172_s19, %s173_s20  }
  0x13   :  { %s174_s23 = smov [#allocation6]   ;;  %s121_s27 = scalar_lea.hbm %s232_s1, 256 }
  0x14   :  { %s27_s24 = sshll.u32 %s174_s23, 4  ;;  %p122_p8 = scmp.ne.s32.totalorder %s232_s1, %s121_s27  ;;  %s28_s24 = int_to_ptr.vmem [resolvable:$true] %s27_s24 }
  0x15   :  { %p125_p9 = scmp.lt.u32.totalorder %s121_s27, %s232_s1 }
  0x17   :  { %p127_p10 = pnand %p125_p9, %p122_p8 }
  0x19   :  { %130 = shalt.err (!%p127_p10)
}
  0x1a   :  { %s131_s4 = scalar_lea.vmem %s28_s24, 256  ;;  %p136_p12 = scmp.lt.s32.totalorder %s28_s24, %s28_s24 }
  0x1b   :  { %p132_p11 = scmp.ne.s32.totalorder %s28_s24, %s131_s4  ;;  %p137_p13 = scmp.lt.s32.totalorder %s131_s4, %s131_s4 }
  0x1d   :  { %p138_p0 = por %p137_p13, %p136_p12 }
  0x1f   :  { %p139_p1 = pnand %p138_p0, %p132_p11 }
  0x21   :  { %142 = shalt.err (!%p139_p1)
}
  0x22   :  { %33 = dma.hbm_to_vmem [thread:$0]  %s232_s1, 256, %s28_s24, [#allocation7], %s172_s19, %s172_s19, %s173_s20  }
  0x23   :  { %165 = dma.done.wait [#allocation4], 256  }
  0x24   :  { %166 = vsyncadd [#allocation4], 4294967040 }
  0x25   :  { %167 = dma.done.wait [#allocation7], 256  }
  0x26   :  { %168 = vsyncadd [#allocation7], 4294967040  ;;  %v46_v0 = vld [vmem:[#allocation3] sm:$0xff]  ;;  %v47_v1 = vld [vmem:[#allocation3 + $0x8] sm:$0xff]  ;;  %vm44_vm0 = vcmask 0   ;;  %v175_v9 = vmov 0.0  }
  0x27   :  { %v48_v2 = vld [vmem:[#allocation6] sm:$0xff]  ;;  %v49_v3 = vld [vmem:[#allocation6 + $0x8] sm:$0xff]  ;;  %45 = vst.msk [vmem:[#allocation2] sm:$0x1] %vm44_vm0, %v175_v9  ;;  %s176_s6 = smov [#allocation8]  }
  0x28   :  { %v50_v4 = vsub.f32 %v46_v0, %v48_v2  ;;  %v51_v5 = vsub.f32 %v47_v1, %v49_v3  ;;  %s81_s7 = sshll.u32 %s176_s6, 4  ;;  %s82_s7 = int_to_ptr.vmem [resolvable:$true] %s81_s7 }
  0x29   :  { %s143_s8 = scalar_lea.vmem %s82_s7, 16  ;;  %s147_s9 = scalar_lea.vmem %s82_s7, 32 }
  0x2a   :  { %v53_v6 = vmul.f32 %v50_v4, %v50_v4  ;;  %v54_v7 = vmul.f32 %v51_v5, %v51_v5  ;;  %p144_p2 = scmp.ne.s32.totalorder %s82_s7, %s143_s8  ;;  %p148_p3 = scmp.lt.s32.totalorder %s82_s7, %s82_s7 }
  0x2b   :  { %p149_p4 = scmp.lt.s32.totalorder %s147_s9, %s143_s8 }
  0x2c   :  { %v55_v8 = vadd.f32 %v54_v7, %v53_v6 }
  0x2d   :  { %p150_p5 = por %p149_p4, %p148_p3 }
  0x2e   :  { %56 = vadd.xlane.f32.xlu0 %v55_v8  ;;  %v52_v17 = vld [vmem:[#allocation2] sm:$0x1] }
  0x2f   :  { %p151_p6 = pnand %p150_p5, %p144_p2 }
  0xbb   :  { %v57_v10 = vpop.xlane.xlu0 %56 }
  0xbc   :  { %v58_v11 = vrot.slane %v57_v10, 4 }
  0xbe   :  { %v59_v12 = vadd.f32 %v58_v11, %v57_v10 }
  0xc0   :  { %v60_v13 = vrot.slane %v59_v12, 2 }
  0xc2   :  { %v61_v14 = vadd.f32 %v60_v13, %v59_v12 }
  0xc4   :  { %v62_v15 = vrot.slane %v61_v14, 1 }
  0xc6   :  { %v63_v16 = vadd.f32 %v62_v15, %v61_v14 }
  0xc8   :  { %91 = vpush %v63_v16 }
  0xf9   :  { %s92_s1 = spop %91 }
  0xfa   :  { %v65_v18 = vstv %s92_s1 }
  0xfb   :  { %v66_v19 = vadd.f32 %v65_v18, %v52_v17 }
  0xfd   :  { %68 = vst.msk [vmem:[#allocation2] sm:$0x1] %vm44_vm0, %v66_v19 }
 0x104   :  { %v72_v20 = vld [vmem:[#allocation2] sm:$0x1] }
 0x105   :  { %v73_v21 = vmul.f32 0.00048828125, %v72_v20 }
 0x107   :  { %74 = vst.msk [vmem:[#allocation8] sm:$0x1] %vm44_vm0, %v73_v21 }
 0x108   :  { %154 = shalt.err (!%p151_p6)
}
 0x109   :  { %s155_s12 = scalar_lea.hbm %s233_s2, 16 }
 0x10a   :  { %p156_p7 = scmp.ne.s32.totalorder %s233_s2, %s155_s12  ;;  %p159_p8 = scmp.lt.u32.totalorder %s155_s12, %s233_s2 }
 0x10c   :  { %p161_p9 = pnand %p159_p8, %p156_p7 }
 0x10e   :  { %164 = shalt.err (!%p161_p9)
}
 0x10f   :  { %84 = dma.vmem_to_hbm [thread:$0]  %s82_s7, 16, %s233_s2, [#allocation5]  }
 0x110   :  { %169 = dma.done.wait [#allocation5], 16  }
 0x111   :  { %170 = vsyncadd [#allocation5], 4294967280 }
 0x112   :  { %88 = vsyncpa [#allocation4], 1 }
 0x113   :  { %89 = vsyncpa [#allocation7], 1 }
 0x114   :  { %90 = vsyncpa [#allocation5], 1 }

</bundles_post_ra>
